<compile_context>
chip_gen: v7x
topology: tpu7x:2x2x1
jax: 0.10.0
libtpu: 0.0.40
codegen_flags: <defaults>
</compile_context>

<pallas_src>
import jax
import jax.numpy as jnp
from jax.experimental import pallas as pl
from jax.experimental.pallas import tpu as pltpu


_SAFE_DEFAULT_VMEM = 16 * 1024 * 1024   # v5e default scoped VMEM


def _round_up(x, m):
    return -(-x // m) * m


def _text_encoder_kernel(ids_ref, m_ref, emb_ref, w_ref, b_ref, o_ref):
    """One batch tile (TB rows) per grid step.

    ids_ref : (TB, L)   int32  token ids
    m_ref   : (TB, L)   f32    pre-scaled mask (mask / max(len, 1))
    emb_ref : (Vp, H)   cdt    embedding table (vocab lane-padded)
    w_ref   : (H, Dp)   cdt    projection weight (feature lane-padded)
    b_ref   : (1, Dp)   f32    projection bias
    o_ref   : (TB, Dp)  f32    L2-normalized text feature
    """
    tb, L = ids_ref.shape
    Vp = emb_ref.shape[0]

    # Fused gather + masked mean pooling:
    #   bag[b, v] = sum_l m[b, l] * (ids[b, l] == v)      (VPU select + XLU sublane reduce)
    #   pooled    = bag @ emb_table                        (MXU, f32 accumulation)
    # Mathematically identical to sum_l m[b, l] * table[ids[b, l]].
    vocab_iota = jax.lax.broadcasted_iota(jnp.int32, (tb, L, Vp), 2)
    weighted_onehot = jnp.where(ids_ref[...][:, :, None] == vocab_iota,
                                m_ref[...][:, :, None], 0.0)          # (TB, L, Vp) f32
    bag = jnp.sum(weighted_onehot, axis=1)                            # (TB, Vp) f32

    pooled = jnp.dot(bag.astype(emb_ref.dtype), emb_ref[...],
                     preferred_element_type=jnp.float32)              # (TB, H) f32

    # Linear projection on the MXU: (TB, H) x (H, Dp), f32 accumulation.
    feat = jnp.dot(pooled.astype(w_ref.dtype), w_ref[...],
                   preferred_element_type=jnp.float32) + b_ref[...]   # (TB, Dp) f32

    # F.normalize(p=2, dim=-1): x / max(||x||, eps), eps = 1e-12
    #   == x * rsqrt(max(sum(x^2), eps^2))   (rsqrt on the EUP).
    ss = jnp.sum(feat * feat, axis=-1, keepdims=True)
    o_ref[...] = feat * jax.lax.rsqrt(jnp.maximum(ss, 1e-24))


def _tpu_info():
    """(physical VMEM bytes, #TensorCores sharing a 'parallel' grid)."""
    vmem_cap = 64 * 1024 * 1024          # conservative fallback (v7x per-TC)
    try:
        vmem_cap = int(pltpu.get_tpu_info().vmem_capacity_bytes)
    except Exception:
        pass
    num_tc = 1
    try:
        kind = (jax.devices()[0].device_kind or "").lower()
        if "v7" in kind:
            num_tc = 2                   # v7x: 2 TensorCores per chip
    except Exception:
        pass
    return vmem_cap, num_tc


def _vmem_plan(batch, L, Vp, H, Dp, itemsize, vmem_cap, num_tc, tb=None):
    """Pick the batch tile TB and (optionally) a vmem_limit_bytes to request."""
    # Every pipelined block is double-buffered; also count the constant
    # table / w / b blocks and the in-kernel temporaries.
    const = (2 * Vp * H * itemsize          # embedding table (x2 buffers)
             + 2 * H * Dp * itemsize        # projection weight
             + 2 * 8 * Dp * 4)              # bias (sublane-padded to 8 rows)
    per_row = (2 * L * 4                    # ids block (int32)
               + 2 * L * 4                  # scaled-mask block (f32)
               + 2 * Dp * 4                 # output block (f32)
               + (L * Vp + Vp + H + 2 * Dp) * 4)   # in-kernel temporaries

    bp8 = _round_up(max(batch, 1), 8)
    if tb is None:
        budget = min(32 * 1024 * 1024, vmem_cap // 2)   # generation-aware budget
        tb_fit = (budget - const) // per_row if budget > const else 0
        tb = min(bp8, (tb_fit // 8) * 8)
        if tb < 8:
            tb = 8                          # minimum sublane tile; raise limit below
        # Only force >=2 grid steps on multi-TC chips (v7x); a split on a
        # single-TC chip is just a serial loop with extra per-step overhead.
        if num_tc >= 2 and bp8 >= 16:
            tb = min(tb, max(8, ((bp8 // 2) // 8) * 8))
    else:
        tb = max(8, (min(tb, bp8) // 8) * 8)

    need = const + per_row * tb
    vmem_limit = None
    if need > _SAFE_DEFAULT_VMEM:
        vmem_limit = int(min(vmem_cap * 3 // 4, need + 4 * 1024 * 1024))
    return tb, vmem_limit


def text_model_forward(token_ids, mask, emb_table, proj_w, proj_b, *,
                       tb=None, compute_dtype=jnp.float32):
    """TextModel.forward equivalent on pre-tokenized ids.

    token_ids: [B, L] int32, mask: [B, L] f32, emb_table: [V, H],
    proj_w: [H, D], proj_b: [D]  ->  [B, D] f32 (L2-normalized).
    """
    B, L = token_ids.shape
    V, H = emb_table.shape
    D = proj_w.shape[1]
    itemsize = jnp.dtype(compute_dtype).itemsize

    # Pre-scale the mask so pooling is a pure weighted sum (masked mean).
    # Kept in f32 regardless of compute_dtype (numerics of the 1/len weights).
    m_scaled = (mask / jnp.maximum(mask.sum(-1, keepdims=True), 1.0)
                ).astype(jnp.float32)

    # Lane-dense vocab & feature dims.  Zero padding is exact: padded vocab rows
    # are never selected, padded feature columns contribute 0 to the L2 norm.
    Vp = _round_up(V, 128)
    Dp = _round_up(D, 128)
    table = jnp.pad(emb_table, ((0, Vp - V), (0, 0))).astype(compute_dtype)
    w = jnp.pad(proj_w, ((0, 0), (0, Dp - D))).astype(compute_dtype)
    b = jnp.pad(proj_b, (0, Dp - D)).astype(jnp.float32).reshape(1, Dp)

    vmem_cap, num_tc = _tpu_info()
    tb, vmem_limit = _vmem_plan(B, L, Vp, H, Dp, itemsize, vmem_cap, num_tc, tb)
    Bp = _round_up(B, tb)

    ids = token_ids.astype(jnp.int32)
    if Bp != B:
        # Pad the cheap [B, L] ids / mask — never a [B, L, H] activation.
        ids = jnp.pad(ids, ((0, Bp - B), (0, 0)))
        m_scaled = jnp.pad(m_scaled, ((0, Bp - B), (0, 0)))

    flops = 2 * Bp * Vp * H + 2 * Bp * H * Dp
    bytes_accessed = (Bp * L * 4 * 2 + Vp * H * itemsize
                      + H * Dp * itemsize + 8 * Dp * 4 + Bp * Dp * 4)

    compiler_kwargs = dict(dimension_semantics=("parallel",))
    if vmem_limit is not None:
        compiler_kwargs["vmem_limit_bytes"] = vmem_limit

    out = pl.pallas_call(
        _text_encoder_kernel,
        out_shape=jax.ShapeDtypeStruct((Bp, Dp), jnp.float32),
        grid_spec=pltpu.PrefetchScalarGridSpec(
            num_scalar_prefetch=0,
            grid=(Bp // tb,),
            in_specs=[
                pl.BlockSpec((tb, L), lambda i: (i, 0)),      # token ids
                pl.BlockSpec((tb, L), lambda i: (i, 0)),      # scaled mask
                pl.BlockSpec((Vp, H), lambda i: (0, 0)),      # embedding table
                pl.BlockSpec((H, Dp), lambda i: (0, 0)),      # projection weight
                pl.BlockSpec((1, Dp), lambda i: (0, 0)),      # projection bias
            ],
            out_specs=pl.BlockSpec((tb, Dp), lambda i: (i, 0)),
        ),
        compiler_params=pltpu.CompilerParams(**compiler_kwargs),
        cost_estimate=pl.CostEstimate(
            flops=int(flops), transcendentals=int(Bp),
            bytes_accessed=int(bytes_accessed)),
    )(ids, m_scaled, table, w, b)

    return out[:B, :D]


def get_lan_mask(text_lens, max_len):
    """getLanMask: mask[i, j] = 1.0 if j < text_lens[i] else 0.0."""
    pos = jnp.arange(max_len)[None, :]
    return (pos < text_lens[:, None]).astype(jnp.float32)


class TextFeatureExtractorPallas:
    """Synthetic Pallas port of TextFeatureExtractor / TextModel."""

    def __init__(self, vocab_size=128, max_text_len=8, hidden=32, feat_dim=32,
                 seed=0):
        self.max_text_len = max_text_len
        k = jax.random.PRNGKey(seed)
        k_emb, k_w, k_b = jax.random.split(k, 3)
        self.emb_table = jax.random.normal(
            k_emb, (vocab_size, hidden), dtype=jnp.float32) * 0.02
        self.proj_w = jax.random.normal(
            k_w, (hidden, feat_dim), dtype=jnp.float32) * 0.02
        self.proj_b = jax.random.normal(
            k_b, (feat_dim,), dtype=jnp.float32) * 0.02

    def extract(self, token_ids, text_lens, compute_dtype=jnp.float32):
        """token_ids: [B, L] int32, text_lens: [B] int32 -> [B, D] f32."""
        if token_ids is None:
            return None
        mask = get_lan_mask(text_lens, self.max_text_len)   # getLanMask
        # Gather + masked pool + projection + L2-normalize are all fused in the
        # Pallas kernel (no [B, L, H] intermediate in HBM).
        return text_model_forward(token_ids, mask, self.emb_table,
                                  self.proj_w, self.proj_b,
                                  compute_dtype=compute_dtype)

    def forward(self, inputs):
        # Matches nn.Module.forward of the spec: identity pass-through.
        return inputs


if __name__ == "__main__":
    B, L, H, D, V = 16, 8, 32, 32, 128
    extractor = TextFeatureExtractorPallas(
        vocab_size=V, max_text_len=L, hidden=H, feat_dim=D, seed=0)

    key = jax.random.PRNGKey(0)
    k_ids, k_len = jax.random.split(key)
    token_ids = jax.random.randint(k_ids, (B, L), 0, V, dtype=jnp.int32)
    text_lens = jax.random.randint(k_len, (B,), 3, L + 1, dtype=jnp.int32)

    # f32 path (default; matches PyTorch numerics).
    feats = jax.block_until_ready(extractor.extract(token_ids, text_lens))

    # Pure-JAX reference (embedding gather + masked mean pool + proj + L2 norm).
    mask = get_lan_mask(text_lens, L)
    emb = extractor.emb_table[token_ids]
    pooled = (emb * mask[..., None]).sum(1) / jnp.maximum(
        mask.sum(-1, keepdims=True), 1.0)
    ref = pooled @ extractor.proj_w + extractor.proj_b
    ref = ref / jnp.maximum(
        jnp.sqrt((ref * ref).sum(-1, keepdims=True)), 1e-12)
    assert feats.shape == (B, D)
    assert jnp.allclose(feats, ref, atol=1e-4), "f32 mismatch vs reference"

    # Optional bf16 table/weight path (mask, accumulation, normalize stay f32).
    feats_bf16 = jax.block_until_ready(
        extractor.extract(token_ids, text_lens, compute_dtype=jnp.bfloat16))
    assert feats_bf16.shape == (B, D)
    assert jnp.allclose(feats_bf16, ref, atol=5e-2), "bf16 mismatch vs reference"

    # Identity forward of the literal module.
    assert extractor.forward(feats) is feats

    print("KERNEL_OK")
</pallas_src>

<mosaic_0001>
module attributes {stable_mosaic.version = 11 : i64} {
  func.func @_text_encoder_kernel(%arg0: i32, %arg1: memref<16x8xi32, #tpu.memory_space<vmem>>, %arg2: memref<16x8xf32, #tpu.memory_space<vmem>>, %arg3: memref<128x32xf32, #tpu.memory_space<vmem>>, %arg4: memref<32x128xf32, #tpu.memory_space<vmem>>, %arg5: memref<1x128xf32, #tpu.memory_space<vmem>>, %arg6: memref<16x128xf32, #tpu.memory_space<vmem>>) attributes {dimension_semantics = [#tpu.dimension_semantics<parallel>], iteration_bounds = array<i64: 1>, scalar_prefetch = 0 : i64, scratch_operands = 0 : i64, tpu.core_type = #tpu.core_type<tc>, window_params = [{transform_indices = @transform_0, window_bounds = array<i64: 16, 8>}, {transform_indices = @transform_1, window_bounds = array<i64: 16, 8>}, {pipeline_mode = #tpu.pipeline_mode<synchronous>, transform_indices = @transform_2, window_bounds = array<i64: 128, 32>}, {pipeline_mode = #tpu.pipeline_mode<synchronous>, transform_indices = @transform_3, window_bounds = array<i64: 32, 128>}, {pipeline_mode = #tpu.pipeline_mode<synchronous>, transform_indices = @transform_4, window_bounds = array<i64: 1, 128>}, {transform_indices = @transform_5, window_bounds = array<i64: 16, 128>}]} {
    %0 = tpu.iota {dimensions = array<i32: 2>} : vector<16x8x128xi32>
    %c0 = arith.constant 0 : index
    %c0_0 = arith.constant 0 : index
    %1 = vector.load %arg1[%c0, %c0_0] : memref<16x8xi32, #tpu.memory_space<vmem>>, vector<16x8xi32>
    %2 = vector.shape_cast %1 : vector<16x8xi32> to vector<16x8x1xi32>
    %3 = vector.broadcast %2 : vector<16x8x1xi32> to vector<16x8x128xi32>
    %4 = arith.cmpi eq, %3, %0 : vector<16x8x128xi32>
    %c0_1 = arith.constant 0 : index
    %c0_2 = arith.constant 0 : index
    %5 = vector.load %arg2[%c0_1, %c0_2] : memref<16x8xf32, #tpu.memory_space<vmem>>, vector<16x8xf32>
    %6 = vector.shape_cast %5 : vector<16x8xf32> to vector<16x8x1xf32>
    %cst = arith.constant 0.000000e+00 : f32
    %7 = vector.shape_cast %6 : vector<16x8x1xf32> to vector<16x8x1xf32>
    %8 = vector.broadcast %7 : vector<16x8x1xf32> to vector<16x8x128xf32>
    %9 = vector.broadcast %cst : f32 to vector<16x8x128xf32>
    %10 = arith.select %4, %8, %9 : vector<16x8x128xi1>, vector<16x8x128xf32>
    %cst_3 = arith.constant dense<0.000000e+00> : vector<16x128xf32>
    %11 = vector.multi_reduction <add>, %10, %cst_3 [1] : vector<16x8x128xf32> to vector<16x128xf32>
    %c0_4 = arith.constant 0 : index
    %c0_5 = arith.constant 0 : index
    %12 = vector.load %arg3[%c0_4, %c0_5] : memref<128x32xf32, #tpu.memory_space<vmem>>, vector<128x32xf32>
    %cst_6 = arith.constant dense<0.000000e+00> : vector<16x32xf32>
    %13 = tpu.matmul %11, %12, %cst_6 {dimension_numbers = #tpu.dot_dimension_numbers<[1], [0], [0], [1], [0, 0, 1, 1], [], []>} : vector<16x128xf32>, vector<128x32xf32>, vector<16x32xf32> -> vector<16x32xf32>
    %c0_7 = arith.constant 0 : index
    %c0_8 = arith.constant 0 : index
    %14 = vector.load %arg4[%c0_7, %c0_8] : memref<32x128xf32, #tpu.memory_space<vmem>>, vector<32x128xf32>
    %cst_9 = arith.constant dense<0.000000e+00> : vector<16x128xf32>
    %15 = tpu.matmul %13, %14, %cst_9 {dimension_numbers = #tpu.dot_dimension_numbers<[1], [0], [0], [1], [0, 0, 1, 1], [], []>} : vector<16x32xf32>, vector<32x128xf32>, vector<16x128xf32> -> vector<16x128xf32>
    %c0_10 = arith.constant 0 : index
    %c0_11 = arith.constant 0 : index
    %16 = vector.load %arg5[%c0_10, %c0_11] : memref<1x128xf32, #tpu.memory_space<vmem>>, vector<1x128xf32>
    %17 = vector.broadcast %16 : vector<1x128xf32> to vector<16x128xf32>
    %18 = arith.addf %15, %17 : vector<16x128xf32>
    %19 = arith.mulf %18, %18 : vector<16x128xf32>
    %cst_12 = arith.constant dense<0.000000e+00> : vector<16xf32>
    %20 = vector.multi_reduction <add>, %19, %cst_12 [1] : vector<16x128xf32> to vector<16xf32>
    %21 = vector.shape_cast %20 : vector<16xf32> to vector<16x1xf32>
    %cst_13 = arith.constant 1.000000e-24 : f32
    %22 = vector.broadcast %cst_13 : f32 to vector<16x1xf32>
    %23 = arith.maximumf %21, %22 : vector<16x1xf32>
    %24 = math.rsqrt %23 : vector<16x1xf32>
    %25 = vector.broadcast %24 : vector<16x1xf32> to vector<16x128xf32>
    %26 = arith.mulf %18, %25 : vector<16x128xf32>
    %c0_14 = arith.constant 0 : index
    %c0_15 = arith.constant 0 : index
    %27 = vector.load %arg6[%c0_14, %c0_15] : memref<16x128xf32, #tpu.memory_space<vmem>>, vector<16x128xf32>
    tpu.vector_store %arg6[%c0_14, %c0_15], %26 {strides = array<i32>} : memref<16x128xf32, #tpu.memory_space<vmem>>, vector<16x128xf32>,
    return
  }
  func.func @transform_0(%arg0: i32) -> (i32, i32) {
    %c0_i32 = arith.constant 0 : i32
    %c0_i32_0 = arith.constant 0 : i32
    return %arg0, %c0_i32 : i32, i32
  }
  func.func @transform_1(%arg0: i32) -> (i32, i32) {
    %c0_i32 = arith.constant 0 : i32
    %c0_i32_0 = arith.constant 0 : i32
    return %arg0, %c0_i32 : i32, i32
  }
  func.func @transform_2(%arg0: i32) -> (i32, i32) {
    %c0_i32 = arith.constant 0 : i32
    %c0_i32_0 = arith.constant 0 : i32
    %c0_i32_1 = arith.constant 0 : i32
    return %c0_i32, %c0_i32_0 : i32, i32
  }
  func.func @transform_3(%arg0: i32) -> (i32, i32) {
    %c0_i32 = arith.constant 0 : i32
    %c0_i32_0 = arith.constant 0 : i32
    %c0_i32_1 = arith.constant 0 : i32
    return %c0_i32, %c0_i32_0 : i32, i32
  }
  func.func @transform_4(%arg0: i32) -> (i32, i32) {
    %c0_i32 = arith.constant 0 : i32
    %c0_i32_0 = arith.constant 0 : i32
    %c0_i32_1 = arith.constant 0 : i32
    return %c0_i32, %c0_i32_0 : i32, i32
  }
  func.func @transform_5(%arg0: i32) -> (i32, i32) {
    %c0_i32 = arith.constant 0 : i32
    %c0_i32_0 = arith.constant 0 : i32
    return %arg0, %c0_i32 : i32, i32
  }
}

</mosaic_0001>

<bundles_post_ra>
// kernel: tpu_custom_call.1
= control target key start
LH: loop header
LB: loop body
LE: loop exit
PB: predicated region body
PF: predicated region fallthrough
CT: control target
= control target key end

     0   :  { %v21_v0 = vlaneseq  ;;  %s983_s0 = inlined_call_operand.vmem [shape: s32[16,8], index: 0, kind: input, shape index: {}]   ;;  %s984_s1 = inlined_call_operand.vmem [shape: f32[16,8], index: 1, kind: input, shape index: {}]   ;;  %s985_s2 = inlined_call_operand.vmem [shape: f32[128,32], index: 2, kind: input, shape index: {}]   ;;  %s986_s3 = inlined_call_operand.vmem [shape: f32[32,128], index: 3, kind: input, shape index: {}]   ;;  %s987_s4 = inlined_call_operand.vmem [shape: f32[1,128], index: 4, kind: input, shape index: {}]   ;;  %s988_s5 = inlined_call_operand.hbm [shape: f32[16,128], index: 5, kind: output, shape index: {}]  }
   0x1   :  { %10 = vsyncpa [#allocation3], 0  ;;  %v815_v2 = vld [vmem:[%s983_s0] sm:$0xff]  ;;  %v823_v6 = vld [vmem:[%s983_s0 + $0x8] sm:$0xff]  ;;  %vm411_vm11 = vcmask 1041409   ;;  %vm413_vm12 = vcmask 1042434  }
   0x2   :  { %v810_v1 = vshrl.u32 %v21_v0, 7  ;;  %v832_v11 = vld [vmem:[%s984_s1] sm:$0xff]  ;;  %v844_v19 = vld [vmem:[%s984_s1 + $0x8] sm:$0xff]  ;;  %v381_v36 = vld [vmem:[%s985_s2 + $0x10] sm:$0xff]  ;;  %vm415_vm15 = vcmask 1043459   ;;  %s776_s12 = smov [#allocation2]  }
   0x3   :  { %v379_v30 = vld [vmem:[%s985_s2] sm:$0xff]  ;;  %v380_v31 = vld [vmem:[%s985_s2 + $0x8] sm:$0xff]  ;;  %v382_v37 = vld [vmem:[%s985_s2 + $0x18] sm:$0xff]  ;;  %s621_s13 = sshll.u32 %s776_s12, 4  ;;  %s622_s13 = int_to_ptr.vmem [resolvable:$true] %s621_s13 }
   0x4   :  { %v41_v3 = vsub.s32 2, %v810_v1  ;;  %v27_v4 = vsub.s32 0, %v810_v1  ;;  %v34_v5 = vsub.s32 1, %v810_v1  ;;  %v48_v14 = vsub.s32 3, %v810_v1  ;;  %v383_v41 = vld [vmem:[%s985_s2 + $0x20] sm:$0xff]  ;;  %v384_v42 = vld [vmem:[%s985_s2 + $0x28] sm:$0xff]  ;;  %p757_p1 = scmp.lt.s32.totalorder %s622_s13, %s622_s13 }
   0x5   :  { %v55_v22 = vsub.s32 4, %v810_v1  ;;  %v62_v27 = vsub.s32 5, %v810_v1  ;;  %v705_v32 = vpack.c.bf16 %v380_v31, %v379_v30  ;;  %v69_v35 = vsub.s32 6, %v810_v1  ;;  %v385_v47 = vld [vmem:[%s985_s2 + $0x30] sm:$0xff]  ;;  %v386_v48 = vld [vmem:[%s985_s2 + $0x38] sm:$0xff]  ;;  %v387_v52 = vld [vmem:[%s985_s2 + $0x40] sm:$0xff] }
   0x6   :  { %v42_v7 = vrot.slane %v815_v2, %v41_v3  ;;  %v28_v8 = vrot.slane %v815_v2, %v27_v4  ;;  %v84_v9 = vrot.slane %v823_v6, %v27_v4  ;;  %v35_v10 = vrot.slane %v815_v2, %v34_v5  ;;  %v388_v53 = vld [vmem:[%s985_s2 + $0x48] sm:$0xff]  ;;  %v389_v57 = vld [vmem:[%s985_s2 + $0x50] sm:$0xff]  ;;  %v390_v58 = vld [vmem:[%s985_s2 + $0x58] sm:$0xff] }
   0x7   :  { %v158_v12 = vrot.slane %v832_v11, %v27_v4  ;;  %v91_v13 = vrot.slane %v823_v6, %v34_v5  ;;  %v49_v15 = vrot.slane %v815_v2, %v48_v14  ;;  %v165_v16 = vrot.slane %v832_v11, %v34_v5  ;;  %706 = vmatprep.subr.bf16.mxu0 %v705_v32  ;;  %v391_v62 = vld [vmem:[%s985_s2 + $0x60] sm:$0xff]  ;;  %v392_v63 = vld [vmem:[%s985_s2 + $0x68] sm:$0xff] }
   0x8   :  { %44 = vbcast.lane.b32.xlu1 %v42_v7, 256  ;;  %30 = vbcast.lane.b32.xlu0 %v28_v8, 256  ;;  %v172_v17 = vrot.slane %v832_v11, %v41_v3  ;;  %v98_v18 = vrot.slane %v823_v6, %v41_v3  ;;  %v221_v20 = vrot.slane %v844_v19, %v34_v5  ;;  %v76_v46 = vsub.s32 7, %v810_v1  ;;  %v394_v5 = vld [vmem:[%s985_s2 + $0x78] sm:$0xff]  ;;  %v509_v7 = vld [vmem:[%s986_s3] sm:$0xff]  ;;  %v510_v8 = vld [vmem:[%s986_s3 + $0x8] sm:$0xff] }
   0x9   :  { %v214_v21 = vrot.slane %v844_v19, %v27_v4  ;;  %v105_v23 = vrot.slane %v823_v6, %v48_v14  ;;  %v56_v24 = vrot.slane %v815_v2, %v55_v22  ;;  %v228_v25 = vrot.slane %v844_v19, %v41_v3  ;;  %708 = vmatpush3.bf16.msra.mxu0 %v705_v32  ;;  %v393_v4 = vld [vmem:[%s985_s2 + $0x70] sm:$0xff] }
   0xa   :  { %v179_v26 = vrot.slane %v832_v11, %v48_v14  ;;  %v112_v28 = vrot.slane %v823_v6, %v55_v22  ;;  %v63_v29 = vrot.slane %v815_v2, %v62_v27  ;;  %v235_v33 = vrot.slane %v844_v19, %v48_v14 }
   0xb   :  { %v186_v34 = vrot.slane %v832_v11, %v55_v22  ;;  %v709_v38 = vpack.c.bf16 %v382_v37, %v381_v36  ;;  %v119_v39 = vrot.slane %v823_v6, %v62_v27  ;;  %v70_v40 = vrot.slane %v815_v2, %v69_v35 }
   0xc   :  { %86 = vbcast.lane.b32.xlu1 %v84_v9, 256  ;;  %37 = vbcast.lane.b32.xlu0 %v35_v10, 256  ;;  %v713_v43 = vpack.c.bf16 %v384_v42, %v383_v41  ;;  %v242_v44 = vrot.slane %v844_v19, %v55_v22  ;;  %v193_v45 = vrot.slane %v832_v11, %v62_v27  ;;  %v511_v9 = vld [vmem:[%s986_s3 + $0x10] sm:$0xff] }
   0xd   :  { %710 = vmatprep.subr.bf16.mxu0 %v709_v38  ;;  %v717_v49 = vpack.c.bf16 %v386_v48, %v385_v47  ;;  %v126_v50 = vrot.slane %v823_v6, %v69_v35  ;;  %v77_v51 = vrot.slane %v815_v2, %v76_v46  ;;  %v721_v54 = vpack.c.bf16 %v388_v53, %v387_v52 }
   0xe   :  { %712 = vmatpush3.bf16.msra.mxu0 %v709_v38  ;;  %v249_v55 = vrot.slane %v844_v19, %v62_v27  ;;  %v200_v56 = vrot.slane %v832_v11, %v69_v35  ;;  %v725_v59 = vpack.c.bf16 %v390_v58, %v389_v57  ;;  %v207_v60 = vrot.slane %v832_v11, %v76_v46  ;;  %v512_v11 = vld [vmem:[%s986_s3 + $0x18] sm:$0xff] }
   0xf   :  { %714 = vmatprep.subr.bf16.mxu0 %v713_v43  ;;  %v133_v61 = vrot.slane %v823_v6, %v76_v46  ;;  %v729_v1 = vpack.c.bf16 %v392_v63, %v391_v62  ;;  %v263_v2 = vrot.slane %v844_v19, %v76_v46  ;;  %v256_v3 = vrot.slane %v844_v19, %v69_v35 }
  0x10   :  { %160 = vbcast.lane.b32.xlu1 %v158_v12, 256  ;;  %93 = vbcast.lane.b32.xlu0 %v91_v13, 256  ;;  %v733_v6 = vpack.c.bf16 %v394_v5, %v393_v4  ;;  %v737_v10 = vpack.c.bf16 %v510_v8, %v509_v7  ;;  %v741_v12 = vpack.c.bf16 %v512_v11, %v511_v9 }
  0x12   :  { %716 = vmatpush3.bf16.msra.mxu0 %v713_v43  ;;  %738 = vmatprep.subr.bf16.mxu1 %v737_v10 }
  0x13   :  { %718 = vmatprep.subr.bf16.mxu0 %v717_v49  ;;  %740 = vmatpush3.bf16.msra.mxu1 %v737_v10 }
  0x14   :  { %51 = vbcast.lane.b32.xlu1 %v49_v15, 256  ;;  %167 = vbcast.lane.b32.xlu0 %v165_v16, 256 }
  0x15   :  { %742 = vmatprep.subr.bf16.mxu1 %v741_v12 }
  0x16   :  { %720 = vmatpush3.bf16.msra.mxu0 %v717_v49 }
  0x17   :  { %722 = vmatprep.subr.bf16.mxu0 %v721_v54  ;;  %744 = vmatpush3.bf16.msra.mxu1 %v741_v12 }
  0x18   :  { %174 = vbcast.lane.b32.xlu1 %v172_v17, 256  ;;  %100 = vbcast.lane.b32.xlu0 %v98_v18, 256 }
  0x1a   :  { %724 = vmatpush3.bf16.msra.mxu0 %v721_v54 }
  0x1b   :  { %726 = vmatprep.subr.bf16.mxu0 %v725_v59 }
  0x1c   :  { %223 = vbcast.lane.b32.xlu1 %v221_v20, 256  ;;  %216 = vbcast.lane.b32.xlu0 %v214_v21, 256 }
  0x1e   :  { %728 = vmatpush3.bf16.msra.mxu0 %v725_v59 }
  0x1f   :  { %730 = vmatprep.subr.bf16.mxu0 %v729_v1 }
  0x20   :  { %107 = vbcast.lane.b32.xlu1 %v105_v23, 256  ;;  %58 = vbcast.lane.b32.xlu0 %v56_v24, 256 }
  0x22   :  { %732 = vmatpush3.bf16.msra.mxu0 %v729_v1 }
  0x23   :  { %734 = vmatprep.subr.bf16.mxu0 %v733_v6 }
  0x24   :  { %230 = vbcast.lane.b32.xlu1 %v228_v25, 256  ;;  %181 = vbcast.lane.b32.xlu0 %v179_v26, 256  ;;  %v933_v25 = vand.u32 127, %v21_v0 }
  0x26   :  { %736 = vmatpush3.bf16.msra.mxu0 %v733_v6 }
  0x28   :  { %114 = vbcast.lane.b32.xlu1 %v112_v28, 256  ;;  %65 = vbcast.lane.b32.xlu0 %v63_v29, 256 }
  0x2c   :  { %237 = vbcast.lane.b32.xlu1 %v235_v33, 256  ;;  %188 = vbcast.lane.b32.xlu0 %v186_v34, 256 }
  0x30   :  { %121 = vbcast.lane.b32.xlu1 %v119_v39, 256  ;;  %72 = vbcast.lane.b32.xlu0 %v70_v40, 256 }
  0x34   :  { %244 = vbcast.lane.b32.xlu1 %v242_v44, 256  ;;  %195 = vbcast.lane.b32.xlu0 %v193_v45, 256 }
  0x38   :  { %128 = vbcast.lane.b32.xlu1 %v126_v50, 256  ;;  %79 = vbcast.lane.b32.xlu0 %v77_v51, 256 }
  0x3c   :  { %251 = vbcast.lane.b32.xlu1 %v249_v55, 256  ;;  %202 = vbcast.lane.b32.xlu0 %v200_v56, 256 }
  0x40   :  { %209 = vbcast.lane.b32.xlu1 %v207_v60, 256  ;;  %135 = vbcast.lane.b32.xlu0 %v133_v61, 256 }
  0x44   :  { %265 = vbcast.lane.b32.xlu1 %v263_v2, 256  ;;  %258 = vbcast.lane.b32.xlu0 %v256_v3, 256 }
  0x7a   :  { %v45_v13 = vpop.permute.xlu1 %44  ;;  %v31_v14 = vpop.permute.xlu0 %30 }
  0x7b   :  { %vm137_vm0 = vcmp.eq.s32.totalorder %v31_v14, %v933_v25  ;;  %vm139_vm2 = vcmp.eq.s32.totalorder %v45_v13, %v933_v25 }
  0x7e   :  { %v87_v15 = vpop.permute.xlu1 %86  ;;  %v38_v16 = vpop.permute.xlu0 %37 }
  0x7f   :  { %vm138_vm1 = vcmp.eq.s32.totalorder %v38_v16, %v933_v25  ;;  %vm145_vm5 = vcmp.eq.s32.totalorder %v87_v15, %v933_v25 }
  0x82   :  { %v161_v17 = vpop.permute.xlu1 %160  ;;  %v94_v18 = vpop.permute.xlu0 %93 }
  0x83   :  { %v267_v28 = vsel %vm137_vm0, %v161_v17, 0.0  ;;  %vm146_vm3 = vcmp.eq.s32.totalorder %v94_v18, %v933_v25 }
  0x84   :  { %v283_v33 = vrot.slane %v267_v28, 4 }
  0x86   :  { %v52_v19 = vpop.permute.xlu1 %51  ;;  %v168_v20 = vpop.permute.xlu0 %167  ;;  %v284_v0 = vadd.f32 %v283_v33, %v267_v28 }
  0x87   :  { %v268_v29 = vsel %vm138_vm1, %v168_v20, 0.0  ;;  %vm140_vm4 = vcmp.eq.s32.totalorder %v52_v19, %v933_v25  ;;  %vm417_vm1 = vcmask 1044484  }
  0x88   :  { %v289_v34 = vrot.slane %v268_v29, 4  ;;  %v285_v42 = vrot.slane %v284_v0, 2 }
  0x8a   :  { %v175_v21 = vpop.permute.xlu1 %174  ;;  %v101_v22 = vpop.permute.xlu0 %100  ;;  %v290_v38 = vadd.f32 %v289_v34, %v268_v29  ;;  %v286_v52 = vadd.f32 %v285_v42, %v284_v0 }
  0x8b   :  { %v269_v30 = vsel %vm139_vm2, %v175_v21, 0.0  ;;  %vm147_vm7 = vcmp.eq.s32.totalorder %v101_v22, %v933_v25  ;;  %vm419_vm2 = vcmask 1045509  }
  0x8c   :  { %v295_v35 = vrot.slane %v269_v30, 4  ;;  %v291_v44 = vrot.slane %v290_v38, 2  ;;  %v287_v63 = vrot.slane %v286_v52, 1 }
  0x8e   :  { %v224_v23 = vpop.permute.xlu1 %223  ;;  %v217_v24 = vpop.permute.xlu0 %216  ;;  %v296_v39 = vadd.f32 %v295_v35, %v269_v30  ;;  %v292_v54 = vadd.f32 %v291_v44, %v290_v38  ;;  %v288_v17 = vadd.f32 %v287_v63, %v286_v52 }
  0x8f   :  { %v276_v43 = vsel %vm146_vm3, %v224_v23, 0.0  ;;  %v275_v47 = vsel %vm145_vm5, %v217_v24, 0.0  ;;  %vm421_vm3 = vcmask 1046534  }
  0x90   :  { %v297_v46 = vrot.slane %v296_v39, 2  ;;  %v337_v48 = vrot.slane %v276_v43, 4  ;;  %v331_v55 = vrot.slane %v275_v47, 4  ;;  %v293_v3 = vrot.slane %v292_v54, 1 }
  0x92   :  { %v108_v26 = vpop.permute.xlu1 %107  ;;  %v59_v27 = vpop.permute.xlu0 %58  ;;  %v298_v56 = vadd.f32 %v297_v46, %v296_v39  ;;  %v338_v58 = vadd.f32 %v337_v48, %v276_v43  ;;  %v332_v4 = vadd.f32 %v331_v55, %v275_v47  ;;  %v294_v18 = vadd.f32 %v293_v3, %v292_v54 }
  0x93   :  { %vm141_vm6 = vcmp.eq.s32.totalorder %v59_v27, %v933_v25  ;;  %vm148_vm8 = vcmp.eq.s32.totalorder %v108_v26, %v933_v25 }
  0x94   :  { %v299_v7 = vrot.slane %v298_v56, 1  ;;  %v339_v11 = vrot.slane %v338_v58, 2  ;;  %v333_v19 = vrot.slane %v332_v4, 2  ;;  %v412_v33 = vsel %vm411_vm11, %v294_v18, %v288_v17 }
  0x96   :  { %v231_v31 = vpop.permute.xlu1 %230  ;;  %v182_v32 = vpop.permute.xlu0 %181  ;;  %v300_v20 = vadd.f32 %v299_v7, %v298_v56  ;;  %v340_v24 = vadd.f32 %v339_v11, %v338_v58  ;;  %v334_v34 = vadd.f32 %v333_v19, %v332_v4 }
  0x97   :  { %v270_v45 = vsel %vm140_vm4, %v182_v32, 0.0  ;;  %v277_v59 = vsel %vm147_vm7, %v231_v31, 0.0  ;;  %vm520_vm7 = vcmask 261120  }
  0x98   :  { %v301_v53 = vrot.slane %v270_v45, 4  ;;  %v343_v8 = vrot.slane %v277_v59, 4 }
  0x9a   :  { %v115_v36 = vpop.permute.xlu1 %114  ;;  %v66_v37 = vpop.permute.xlu0 %65  ;;  %v302_v1 = vadd.f32 %v301_v53, %v270_v45  ;;  %v344_v21 = vadd.f32 %v343_v8, %v277_v59  ;;  %v341_v45 = vrot.slane %v340_v24, 1 }
  0x9b   :  { %vm142_vm9 = vcmp.eq.s32.totalorder %v66_v37, %v933_v25  ;;  %vm149_vm10 = vcmp.eq.s32.totalorder %v115_v36, %v933_v25  ;;  %v414_v37 = vsel %vm413_vm12, %v300_v20, %v412_v33 }
  0x9c   :  { %v303_v15 = vrot.slane %v302_v1, 2  ;;  %v345_v0 = vrot.slane %v344_v21, 2 }
  0x9e   :  { %v238_v40 = vpop.permute.xlu1 %237  ;;  %v189_v41 = vpop.permute.xlu0 %188  ;;  %v304_v29 = vadd.f32 %v303_v15, %v302_v1  ;;  %v346_v53 = vadd.f32 %v345_v0, %v344_v21 }
  0x9f   :  { %v271_v49 = vsel %vm141_vm6, %v189_v41, 0.0  ;;  %v278_v60 = vsel %vm148_vm8, %v238_v40, 0.0  ;;  %vm423_vm6 = vcmask 1047559  }
  0xa0   :  { %v307_v57 = vrot.slane %v271_v49, 4  ;;  %v349_v9 = vrot.slane %v278_v60, 4  ;;  %v305_v46 = vrot.slane %v304_v29, 1  ;;  %v347_v7 = vrot.slane %v346_v53, 1 }
  0xa2   :  { %v122_v50 = vpop.permute.xlu1 %121  ;;  %v73_v51 = vpop.permute.xlu0 %72  ;;  %v308_v10 = vadd.f32 %v307_v57, %v271_v49  ;;  %v350_v22 = vadd.f32 %v349_v9, %v278_v60  ;;  %v335_v49 = vrot.slane %v334_v34, 1  ;;  %v348_v21 = vadd.f32 %v347_v7, %v346_v53 }
  0xa3   :  { %vm150_vm13 = vcmp.eq.s32.totalorder %v122_v50, %v933_v25  ;;  %vm143_vm14 = vcmp.eq.s32.totalorder %v73_v51, %v933_v25 }
  0xa4   :  { %v309_v23 = vrot.slane %v308_v10, 2  ;;  %v351_v38 = vrot.slane %v350_v22, 2 }
  0xa6   :  { %v245_v61 = vpop.permute.xlu1 %244  ;;  %v196_v62 = vpop.permute.xlu0 %195  ;;  %v310_v39 = vadd.f32 %v309_v23, %v308_v10  ;;  %v352_v54 = vadd.f32 %v351_v38, %v350_v22 }
  0xa7   :  { %v272_v2 = vsel %vm142_vm9, %v196_v62, 0.0  ;;  %v279_v5 = vsel %vm149_vm10, %v245_v61, 0.0  ;;  %v306_v61 = vadd.f32 %v305_v46, %v304_v29  ;;  %v632_v46 = vld [vmem:[%s987_s4] ss:$0 sm:$0xff]  ;;  %s752_s4 = scalar_lea.vmem %s622_s13, 256 }
  0xa8   :  { %v313_v6 = vrot.slane %v272_v2, 4  ;;  %v355_v16 = vrot.slane %v279_v5, 4  ;;  %v311_v55 = vrot.slane %v310_v39, 1  ;;  %v353_v10 = vrot.slane %v352_v54, 1  ;;  %p753_p0 = scmp.ne.s32.totalorder %s622_s13, %s752_s4  ;;  %p758_p2 = scmp.lt.s32.totalorder %s752_s4, %s752_s4 }
  0xa9   :  { %v416_v20 = vsel %vm415_vm15, %v306_v61, %v414_v37 }
  0xaa   :  { %v314_v12 = vadd.f32 %v313_v6, %v272_v2  ;;  %v946_v13 = vpop.permute.xlu1 %128  ;;  %v80_v14 = vpop.permute.xlu0 %79  ;;  %v356_v30 = vadd.f32 %v355_v16, %v279_v5  ;;  %v342_v6 = vadd.f32 %v341_v45, %v340_v24  ;;  %v312_v8 = vadd.f32 %v311_v55, %v310_v39  ;;  %p759_p3 = por %p758_p2, %p757_p1 }
  0xab   :  { %vm144_vm0 = vcmp.eq.s32.totalorder %v80_v14, %v933_v25  ;;  %vm151_vm4 = vcmp.eq.s32.totalorder %v946_v13, %v933_v25  ;;  %v336_v14 = vadd.f32 %v335_v49, %v334_v34  ;;  %v354_v24 = vadd.f32 %v353_v10, %v352_v54 }
  0xac   :  { %v315_v26 = vrot.slane %v314_v12, 2  ;;  %v357_v47 = vrot.slane %v356_v30, 2  ;;  %v418_v23 = vsel %vm417_vm1, %v312_v8, %v416_v20  ;;  %p760_p4 = pnand %p759_p3, %p753_p0 }
  0xae   :  { %v252_v27 = vpop.permute.xlu1 %251  ;;  %v203_v28 = vpop.permute.xlu0 %202  ;;  %v316_v40 = vadd.f32 %v315_v26, %v314_v12  ;;  %v358_v62 = vadd.f32 %v357_v47, %v356_v30 }
  0xaf   :  { %v280_v31 = vsel %vm150_vm13, %v252_v27, 0.0  ;;  %v273_v32 = vsel %vm143_vm14, %v203_v28, 0.0 }
  0xb0   :  { %v361_v35 = vrot.slane %v280_v31, 4  ;;  %v319_v36 = vrot.slane %v273_v32, 4  ;;  %v317_v56 = vrot.slane %v316_v40, 1 }
  0xb2   :  { %v362_v41 = vadd.f32 %v361_v35, %v280_v31  ;;  %v320_v42 = vadd.f32 %v319_v36, %v273_v32  ;;  %v210_v43 = vpop.permute.xlu1 %209  ;;  %v136_v44 = vpop.permute.xlu0 %135  ;;  %v318_v11 = vadd.f32 %v317_v56, %v316_v40  ;;  %v425_v32 = vsel %vm411_vm11, %v342_v6, %v336_v14 }
  0xb3   :  { %v274_v48 = vsel %vm144_vm0, %v210_v43, 0.0  ;;  %vm152_vm5 = vcmp.eq.s32.totalorder %v136_v44, %v933_v25  ;;  %v359_v25 = vrot.slane %v358_v62, 1  ;;  %v426_v36 = vsel %vm413_vm12, %v348_v21, %v425_v32 }
  0xb4   :  { %v363_v50 = vrot.slane %v362_v41, 2  ;;  %v321_v51 = vrot.slane %v320_v42, 2  ;;  %v325_v52 = vrot.slane %v274_v48, 4  ;;  %v420_v28 = vsel %vm419_vm2, %v318_v11, %v418_v23 }
  0xb5   :  { %v360_v29 = vadd.f32 %v359_v25, %v358_v62  ;;  %v427_v0 = vsel %vm415_vm15, %v354_v24, %v426_v36 }
  0xb6   :  { %v322_v57 = vadd.f32 %v321_v51, %v320_v42  ;;  %v326_v58 = vadd.f32 %v325_v52, %v274_v48  ;;  %v266_v59 = vpop.permute.xlu1 %265  ;;  %v259_v60 = vpop.permute.xlu0 %258  ;;  %v364_v2 = vadd.f32 %v363_v50, %v362_v41 }
  0xb7   :  { %v282_v63 = vsel %vm152_vm5, %v266_v59, 0.0  ;;  %v281_v1 = vsel %vm151_vm4, %v259_v60, 0.0  ;;  %v428_v40 = vsel %vm417_vm1, %v360_v29, %v427_v0 }
  0xb8   :  { %v323_v3 = vrot.slane %v322_v57, 1  ;;  %v327_v4 = vrot.slane %v326_v58, 2  ;;  %v373_v5 = vrot.slane %v282_v63, 4  ;;  %v367_v9 = vrot.slane %v281_v1, 4 }
  0xb9   :  { %v365_v17 = vrot.slane %v364_v2, 1 }
  0xba   :  { %v328_v12 = vadd.f32 %v327_v4, %v326_v58  ;;  %v374_v13 = vadd.f32 %v373_v5, %v282_v63  ;;  %v324_v15 = vadd.f32 %v323_v3, %v322_v57  ;;  %v368_v16 = vadd.f32 %v367_v9, %v281_v1 }
  0xbb   :  { %v366_v33 = vadd.f32 %v365_v17, %v364_v2 }
  0xbc   :  { %v329_v18 = vrot.slane %v328_v12, 1  ;;  %v375_v19 = vrot.slane %v374_v13, 2  ;;  %v369_v22 = vrot.slane %v368_v16, 2  ;;  %v422_v31 = vsel %vm421_vm3, %v324_v15, %v420_v28 }
  0xbd   :  { %v429_v41 = vsel %vm419_vm2, %v366_v33, %v428_v40 }
  0xbe   :  { %v376_v26 = vadd.f32 %v375_v19, %v374_v13  ;;  %v330_v27 = vadd.f32 %v329_v18, %v328_v12  ;;  %v370_v30 = vadd.f32 %v369_v22, %v368_v16 }
  0xc0   :  { %v377_v34 = vrot.slane %v376_v26, 1  ;;  %v424_v35 = vsel %vm423_vm6, %v330_v27, %v422_v31  ;;  %v371_v37 = vrot.slane %v370_v30, 1 }
  0xc1   :  { %691 = vmatprep.mubr.f32.mxu0 %v424_v35 }
  0xc2   :  { %v378_v38 = vadd.f32 %v377_v34, %v376_v26  ;;  %v372_v39 = vadd.f32 %v371_v37, %v370_v30 }
  0xc4   :  { %v430_v42 = vsel %vm421_vm3, %v372_v39, %v429_v41 }
  0xc5   :  { %v431_v43 = vsel %vm423_vm6, %v378_v38, %v430_v42 }
  0xc6   :  { %692 = vmatmul.mubr.f32.vlgmr.msra.gmra.mrb[0].mxu0 %v431_v43 }
 0x199   :  { %v693_v44 = vpop.f32.mrb[0].mxu0 }
 0x19a   :  { %v500_v45 = vpop.f32.mrb[1].mxu0 }
 0x19b   :  { %702 = vmatprep.mubr.msk.f32.mxu1 %vm520_vm7, %v500_v45 }
 0x19c   :  { %703 = vmatmul.mubr.msk.f32.vlgmr.msra.gmra.mrb[0].mxu1 %vm520_vm7, %v693_v44 }
 0x26f   :  { %v704_v47 = vpop.f32.mrb[0].mxu1 }
 0x270   :  { %v599_v48 = vadd.f32 %v704_v47, %v632_v46  ;;  %v593_v49 = vpop.f32.mrb[1].mxu1 }
 0x271   :  { %v594_v50 = vadd.f32 %v632_v46, %v593_v49 }
 0x272   :  { %v603_v51 = vmul.f32 %v599_v48, %v599_v48 }
 0x273   :  { %v602_v52 = vmul.f32 %v594_v50, %v594_v50 }
 0x274   :  { %606 = vadd.xlane.f32.xlu1 %v603_v51 }
 0x275   :  { %604 = vadd.xlane.f32.xlu0 %v602_v52 }
 0x301   :  { %v607_v53 = vpop.xlane.xlu1 %606 }
 0x302   :  { %v609_v54 = vmax.f32 %v607_v53, 1e-24  ;;  %v605_v55 = vpop.xlane.xlu0 %604 }
 0x303   :  { %v608_v56 = vmax.f32 %v605_v55, 1e-24 }
 0x304   :  { %748 = vrsqrt.f32 %v609_v54 }
 0x305   :  { %750 = vrsqrt.f32 %v608_v56 }
 0x30e   :  { %v749_v57 = vpop.eup %748 }
 0x30f   :  { %v751_v58 = vpop.eup %750  ;;  %v613_v59 = vmul.f32 %v749_v57, %v599_v48 }
 0x310   :  { %v612_v60 = vmul.f32 %v751_v58, %v594_v50 }
 0x311   :  { %615 = vst [vmem:[#allocation2 + $0x8] sm:$0xff] %v613_v59 }
 0x312   :  { %614 = vst [vmem:[#allocation2] sm:$0xff] %v612_v60 }
 0x313   :  { %763 = shalt.err (!%p760_p4)
}
 0x314   :  { %s764_s16 = scalar_lea.hbm %s988_s5, 256 }
 0x315   :  { %p765_p5 = scmp.ne.s32.totalorder %s988_s5, %s764_s16  ;;  %p768_p6 = scmp.lt.u32.totalorder %s764_s16, %s988_s5 }
 0x317   :  { %p770_p7 = pnand %p768_p6, %p765_p5 }
 0x319   :  { %773 = shalt.err (!%p770_p7)
}
 0x31a   :  { %s777_s21 = smov 128   ;;  %s778_s22 = smov 8  }
 0x31b   :  { %627 = dma.vmem_to_hbm [thread:$0]  %s622_s13, 256, %s988_s5, [#allocation3], %s777_s21, %s777_s21, %s778_s22  }
 0x31c   :  { %774 = dma.done.wait [#allocation3], 256  }
 0x31d   :  { %775 = vsyncadd [#allocation3], 4294967040 }
 0x31e   :  { %631 = vsyncpa [#allocation3], 1 }

</bundles_post_ra>
